<compile_context>
chip_gen: v7x
topology: tpu7x:2x2x1
jax: 0.10.0
libtpu: 0.0.40
codegen_flags: <defaults>
</compile_context>

<pallas_src>
import numpy as np
import jax
import jax.numpy as jnp
from jax import lax
from jax.experimental import pallas as pl
from jax.experimental.pallas import tpu as pltpu


# ------- static structure of the pool-grouped conv weight matrix -----------
def _conv_rows_cols():
    rows, cols = [], []
    for di in range(2):                      # position inside the 2x2 pool window
        for dj in range(2):
            g = di * 2 + dj
            for pi in range(3):              # pool-window (output) index
                for pj in range(3):
                    r = g * 16 + (pi * 3 + pj)          # rows 9..15 of each group stay 0
                    oi, oj = 2 * pi + di, 2 * pj + dj   # conv output position
                    for c in range(3):
                        for ky in range(3):
                            for kx in range(3):
                                rows.append(r)
                                cols.append(c * 64 + (oi + ky) * 8 + (oj + kx))
    return np.asarray(rows, np.int32), np.asarray(cols, np.int32)


def _build_scatter_matrix():
    # One-hot S of shape (64*192, 27):  w_mat = (S @ conv_w.flat).reshape(64,192)
    # Replaces the per-call XLA scatter (serialized on TPU) with a dense matvec.
    rows, cols = _conv_rows_cols()
    S = np.zeros((64 * 192, 27), np.float32)
    for idx, (r, c) in enumerate(zip(rows.tolist(), cols.tolist())):
        S[r * 192 + c, idx % 27] = 1.0        # idx % 27 == c*9 + ky*3 + kx
    return S


_SCATTER = _build_scatter_matrix()


# ------------------------------ fused kernel --------------------------------
def _fused_net_kernel(x_ref, wmat_ref, cb_ref, fcw_ref, fcb_ref, o_ref):
    # x_ref   : (TN, 192) f32 -- raw input rows (batch on sublanes, (c,i,j) on lanes)
    # wmat_ref: (64, 192) f32 -- conv weights scattered into pool-grouped rows
    # cb_ref  : (1, 1)    f32 -- conv bias
    # fcw_ref : (2, 16)   f32 -- fc1 weight, zero-padded 9 -> 16 cols
    # fcb_ref : (2, 1)    f32 -- fc1 bias
    # o_ref   : (2, TN)   f32 -- final activations, batch on lanes (lane-dense)

    # conv1 for all 36 output positions as ONE MXU contraction over the last
    # dim of both operands (A @ B.T pattern); result has batch on lanes.
    s = lax.dot_general(wmat_ref[...], x_ref[...],
                        dimension_numbers=(((1,), (1,)), ((), ())),
                        preferred_element_type=jnp.float32)    # (64, TN)

    # 2x2 max pool == elementwise max across the 4 pool-offset groups (VPU).
    # Groups are 16-sublane (tile-aligned) slices; garbage rows 9..15 stay 0.
    m = jnp.maximum(jnp.maximum(s[0:16, :], s[16:32, :]),
                    jnp.maximum(s[32:48, :], s[48:64, :]))     # (16, TN)

    # conv bias + ReLU (bias is scalar and ReLU is monotone, so they commute
    # with the max).  Rows 9..15 become relu(bias) but are cancelled by the
    # zero-padded fc1 weight columns 9..15 below.
    p = jnp.maximum(m + cb_ref[...], 0.0)                      # (16, TN)

    # fc1 (9 -> 2) + bias + ReLU as one tiny MXU matmul (frees VPU/XLU).
    z = jnp.dot(fcw_ref[...], p,
                preferred_element_type=jnp.float32) + fcb_ref[...]   # (2, TN)
    o_ref[...] = jnp.maximum(z, 0.0)


# ------------------------------- wrapper -------------------------------------
def _pick_tile(n):
    """Lane-tile size and grid length for batch n."""
    TN_MAX = 4096                      # ~3 MiB/tile; safe on v5e/v6e/v7x VMEM
    grid_n = pl.cdiv(n, TN_MAX)
    if n > 128:
        grid_n = max(grid_n, 2)        # keep both v7x TensorCores busy
    tn = min(TN_MAX, ((pl.cdiv(n, grid_n) + 127) // 128) * 128)
    return tn, pl.cdiv(n, tn)


def net_forward(x, conv_w, conv_b, fc_w, fc_b):
    N = x.shape[0]
    assert x.shape[1:] == (3, 8, 8), "Net requires (N, 3, 8, 8) input"

    # Metadata-only reshape: NO transpose, NO pad -> a single HBM read of the
    # input (by the kernel).  The ragged last tile is masked by Pallas.
    x_rows = x.reshape(N, 192).astype(jnp.float32)              # (N, 192)

    # conv weight -> (64, 192) pool-grouped matrix via a dense one-hot matvec
    # (batch-independent; cheap, no TPU scatter).
    w_mat = (jnp.asarray(_SCATTER) @ conv_w.reshape(27).astype(jnp.float32)
             ).reshape(64, 192)

    cb = conv_b.reshape(1, 1).astype(jnp.float32)
    fcw = jnp.pad(fc_w.astype(jnp.float32), ((0, 0), (0, 7)))   # (2, 16)
    fcb = fc_b.reshape(2, 1).astype(jnp.float32)

    TN, grid_n = _pick_tile(N)

    out_t = pl.pallas_call(
        _fused_net_kernel,
        out_shape=jax.ShapeDtypeStruct((2, N), jnp.float32),
        grid=(grid_n,),
        in_specs=[
            pl.BlockSpec((TN, 192), lambda i: (i, 0)),   # raw input rows (tiled)
            pl.BlockSpec((64, 192), lambda i: (0, 0)),   # conv weight matrix
            pl.BlockSpec((1, 1), lambda i: (0, 0)),      # conv bias
            pl.BlockSpec((2, 16), lambda i: (0, 0)),     # fc1 weight (padded)
            pl.BlockSpec((2, 1), lambda i: (0, 0)),      # fc1 bias
        ],
        out_specs=pl.BlockSpec((2, TN), lambda i: (0, i)),
        compiler_params=pltpu.CompilerParams(
            dimension_semantics=("parallel",),
            vmem_limit_bytes=32 * 1024 * 1024),
    )(x_rows, w_mat, cb, fcw, fcb)

    return jnp.transpose(out_t)                           # (N, 2)


# --------------------------- pure-JAX reference -------------------------------
def net_forward_ref(x, conv_w, conv_b, fc_w, fc_b):
    conv = lax.conv_general_dilated(
        x, conv_w, window_strides=(1, 1), padding='VALID',
        dimension_numbers=('NCHW', 'OIHW', 'NCHW'))
    conv = jax.nn.relu(conv + conv_b.reshape(1, 1, 1, 1))
    pooled = lax.reduce_window(
        conv, -jnp.inf, lax.max,
        window_dimensions=(1, 1, 2, 2), window_strides=(1, 1, 2, 2),
        padding='VALID')
    flat = pooled.reshape(x.shape[0], 9)
    return jax.nn.relu(flat @ fc_w.T + fc_b)


if __name__ == "__main__":
    key = jax.random.PRNGKey(0)
    k1, k2, k3, k4, k5 = jax.random.split(key, 5)
    # Input spatial = 8 so that conv(3x3) -> 6, pool(2,2) -> 3, flatten -> 1*3*3.
    conv_w = jax.random.normal(k2, (1, 3, 3, 3), dtype=jnp.float32) * 0.2
    conv_b = jax.random.normal(k3, (1,), dtype=jnp.float32) * 0.1
    fc_w = jax.random.normal(k4, (2, 9), dtype=jnp.float32) * 0.2
    fc_b = jax.random.normal(k5, (2,), dtype=jnp.float32) * 0.1

    fwd = jax.jit(net_forward)

    # small batch (single grid step, heavy lane masking 2 -> 128)
    x = jax.random.normal(k1, (2, 3, 8, 8), dtype=jnp.float32)
    out = jax.block_until_ready(fwd(x, conv_w, conv_b, fc_w, fc_b))
    ref = net_forward_ref(x, conv_w, conv_b, fc_w, fc_b)
    np.testing.assert_allclose(np.asarray(out), np.asarray(ref),
                               rtol=1e-5, atol=1e-5)

    # larger batch (2 grid steps + ragged last tile, no padding pass)
    x2 = jax.random.normal(k1, (200, 3, 8, 8), dtype=jnp.float32)
    out2 = jax.block_until_ready(fwd(x2, conv_w, conv_b, fc_w, fc_b))
    ref2 = net_forward_ref(x2, conv_w, conv_b, fc_w, fc_b)
    np.testing.assert_allclose(np.asarray(out2), np.asarray(ref2),
                               rtol=1e-5, atol=1e-5)

    print("KERNEL_OK")
</pallas_src>

<mosaic_0001>
module attributes {stable_mosaic.version = 11 : i64} {
  func.func @_fused_net_kernel(%arg0: i32, %arg1: memref<128x192xf32, #tpu.memory_space<vmem>>, %arg2: memref<64x192xf32, #tpu.memory_space<vmem>>, %arg3: memref<1x1xf32, #tpu.memory_space<vmem>>, %arg4: memref<2x16xf32, #tpu.memory_space<vmem>>, %arg5: memref<2x1xf32, #tpu.memory_space<vmem>>, %arg6: memref<2x128xf32, #tpu.memory_space<vmem>>) attributes {dimension_semantics = [#tpu.dimension_semantics<parallel>], iteration_bounds = array<i64: 1>, scalar_prefetch = 0 : i64, scratch_operands = 0 : i64, tpu.core_type = #tpu.core_type<tc>, window_params = [{transform_indices = @transform_0, window_bounds = array<i64: 128, 192>}, {pipeline_mode = #tpu.pipeline_mode<synchronous>, transform_indices = @transform_1, window_bounds = array<i64: 64, 192>}, {pipeline_mode = #tpu.pipeline_mode<synchronous>, transform_indices = @transform_2, window_bounds = array<i64: 1, 1>}, {pipeline_mode = #tpu.pipeline_mode<synchronous>, transform_indices = @transform_3, window_bounds = array<i64: 2, 16>}, {pipeline_mode = #tpu.pipeline_mode<synchronous>, transform_indices = @transform_4, window_bounds = array<i64: 2, 1>}, {transform_indices = @transform_5, window_bounds = array<i64: 2, 128>}]} {
    %c0 = arith.constant 0 : index
    %c0_0 = arith.constant 0 : index
    %0 = vector.load %arg2[%c0, %c0_0] : memref<64x192xf32, #tpu.memory_space<vmem>>, vector<64x192xf32>
    %c0_1 = arith.constant 0 : index
    %c0_2 = arith.constant 0 : index
    %1 = vector.load %arg1[%c0_1, %c0_2] : memref<128x192xf32, #tpu.memory_space<vmem>>, vector<128x192xf32>
    %cst = arith.constant dense<0.000000e+00> : vector<64x128xf32>
    %2 = tpu.matmul %0, %1, %cst {dimension_numbers = #tpu.dot_dimension_numbers<[1], [1], [0], [0], [0, 0, 1, 0], [], []>} : vector<64x192xf32>, vector<128x192xf32>, vector<64x128xf32> -> vector<64x128xf32>
    %3 = vector.extract_strided_slice %2 {offsets = [0, 0], sizes = [16, 128], strides = [1, 1]} : vector<64x128xf32> to vector<16x128xf32>
    %4 = vector.extract_strided_slice %2 {offsets = [16, 0], sizes = [16, 128], strides = [1, 1]} : vector<64x128xf32> to vector<16x128xf32>
    %5 = arith.maximumf %3, %4 : vector<16x128xf32>
    %6 = vector.extract_strided_slice %2 {offsets = [32, 0], sizes = [16, 128], strides = [1, 1]} : vector<64x128xf32> to vector<16x128xf32>
    %7 = vector.extract_strided_slice %2 {offsets = [48, 0], sizes = [16, 128], strides = [1, 1]} : vector<64x128xf32> to vector<16x128xf32>
    %8 = arith.maximumf %6, %7 : vector<16x128xf32>
    %9 = arith.maximumf %5, %8 : vector<16x128xf32>
    %c0_3 = arith.constant 0 : index
    %c0_4 = arith.constant 0 : index
    %10 = vector.load %arg3[%c0_3, %c0_4] : memref<1x1xf32, #tpu.memory_space<vmem>>, vector<1x1xf32>
    %11 = vector.broadcast %10 : vector<1x1xf32> to vector<16x128xf32>
    %12 = arith.addf %9, %11 : vector<16x128xf32>
    %cst_5 = arith.constant 0.000000e+00 : f32
    %13 = vector.broadcast %cst_5 : f32 to vector<16x128xf32>
    %14 = arith.maximumf %12, %13 : vector<16x128xf32>
    %c0_6 = arith.constant 0 : index
    %c0_7 = arith.constant 0 : index
    %15 = vector.load %arg4[%c0_6, %c0_7] : memref<2x16xf32, #tpu.memory_space<vmem>>, vector<2x16xf32>
    %cst_8 = arith.constant dense<0.000000e+00> : vector<2x128xf32>
    %16 = tpu.matmul %15, %14, %cst_8 {dimension_numbers = #tpu.dot_dimension_numbers<[1], [0], [0], [1], [0, 0, 1, 1], [], []>} : vector<2x16xf32>, vector<16x128xf32>, vector<2x128xf32> -> vector<2x128xf32>
    %c0_9 = arith.constant 0 : index
    %c0_10 = arith.constant 0 : index
    %17 = vector.load %arg5[%c0_9, %c0_10] : memref<2x1xf32, #tpu.memory_space<vmem>>, vector<2x1xf32>
    %18 = vector.broadcast %17 : vector<2x1xf32> to vector<2x128xf32>
    %19 = arith.addf %16, %18 : vector<2x128xf32>
    %cst_11 = arith.constant 0.000000e+00 : f32
    %20 = vector.broadcast %cst_11 : f32 to vector<2x128xf32>
    %21 = arith.maximumf %19, %20 : vector<2x128xf32>
    %c0_12 = arith.constant 0 : index
    %c0_13 = arith.constant 0 : index
    %22 = vector.load %arg6[%c0_12, %c0_13] : memref<2x128xf32, #tpu.memory_space<vmem>>, vector<2x128xf32>
    tpu.vector_store %arg6[%c0_12, %c0_13], %21 {strides = array<i32>} : memref<2x128xf32, #tpu.memory_space<vmem>>, vector<2x128xf32>,
    return
  }
  func.func @transform_0(%arg0: i32) -> (i32, i32) {
    %c0_i32 = arith.constant 0 : i32
    %c0_i32_0 = arith.constant 0 : i32
    return %arg0, %c0_i32 : i32, i32
  }
  func.func @transform_1(%arg0: i32) -> (i32, i32) {
    %c0_i32 = arith.constant 0 : i32
    %c0_i32_0 = arith.constant 0 : i32
    %c0_i32_1 = arith.constant 0 : i32
    return %c0_i32, %c0_i32_0 : i32, i32
  }
  func.func @transform_2(%arg0: i32) -> (i32, i32) {
    %c0_i32 = arith.constant 0 : i32
    %c0_i32_0 = arith.constant 0 : i32
    %c0_i32_1 = arith.constant 0 : i32
    return %c0_i32, %c0_i32_0 : i32, i32
  }
  func.func @transform_3(%arg0: i32) -> (i32, i32) {
    %c0_i32 = arith.constant 0 : i32
    %c0_i32_0 = arith.constant 0 : i32
    %c0_i32_1 = arith.constant 0 : i32
    return %c0_i32, %c0_i32_0 : i32, i32
  }
  func.func @transform_4(%arg0: i32) -> (i32, i32) {
    %c0_i32 = arith.constant 0 : i32
    %c0_i32_0 = arith.constant 0 : i32
    %c0_i32_1 = arith.constant 0 : i32
    return %c0_i32, %c0_i32_0 : i32, i32
  }
  func.func @transform_5(%arg0: i32) -> (i32, i32) {
    %c0_i32 = arith.constant 0 : i32
    %c0_i32_0 = arith.constant 0 : i32
    return %c0_i32, %arg0 : i32, i32
  }
}

</mosaic_0001>

<bundles_post_ra>
// kernel: net_forward.1
= control target key start
LH: loop header
LB: loop body
LE: loop exit
PB: predicated region body
PF: predicated region fallthrough
CT: control target
= control target key end

     0   :  { %vm470_vm0 = vcmask 523264   ;;  %v904_v0 = vmov 0   ;;  %vm906_vm2 = vmmov 0   ;;  %vm659_vm3 = vcmask 130048   ;;  %s1140_s0 = inlined_call_operand.vmem [shape: f32[2,192], index: 0, kind: input, shape index: {}]   ;;  %s1141_s2 = inlined_call_operand.<no memory space> [shape: f32[1,1], index: 2, kind: input, shape index: {}]   ;;  %s1142_s1 = inlined_call_operand.vmem [shape: f32[64,192], index: 1, kind: input, shape index: {}]   ;;  %s1143_s4 = inlined_call_operand.vmem [shape: f32[2,1], index: 4, kind: input, shape index: {}]   ;;  %s1144_s3 = inlined_call_operand.vmem [shape: f32[2,16], index: 3, kind: input, shape index: {}]   ;;  %s1145_s5 = inlined_call_operand.vmem [shape: f32[2,2], index: 5, kind: output, shape index: {}]  }
   0x1   :  { %839 = vset.pattern.permute.xlu0 %v904_v0  ;;  %v10_v1 = vstv %s1141_s2  ;;  %v872_v2 = vld.sshfl [vmem:[%s1140_s0] sm:$0xff pattern:$0x76325410]  ;;  %v873_v3 = vld.sshfl [vmem:[%s1140_s0 + $0x8] sm:$0xff pattern:$0x76325410]  ;;  %vm955_vm1 = vmpackc.low %vm470_vm0, %vm470_vm0 }
   0x2   :  { %11 = vst [vmem:[#allocation2] sm:$0x1] %v10_v1  ;;  %v874_v4 = vld.sshfl [vmem:[%s1140_s0 + $0x10] sm:$0xff pattern:$0x76325410]  ;;  %v183_v10 = vcombine.high %v872_v2, %v873_v3  ;;  %v182_v12 = vcombine.low %v872_v2, %v873_v3  ;;  %v23_v52 = vld [vmem:[%s1142_s1 + $0x8] sm:$0xff] }
   0x3   :  { %v875_v5 = vld.sshfl [vmem:[%s1140_s0 + $0x18] sm:$0xff pattern:$0x76325410]  ;;  %v876_v7 = vld.sshfl [vmem:[%s1140_s0 + $0x20] sm:$0xff pattern:$0x76325410]  ;;  %755 = vmatprep.mubr.msk.f32.mxu0 %vm470_vm0, %v23_v52 }
   0x4   :  { %v877_v8 = vld.sshfl [vmem:[%s1140_s0 + $0x28] sm:$0xff pattern:$0x76325410]  ;;  %v878_v9 = vld.sshfl [vmem:[%s1140_s0 + $0x30] sm:$0xff pattern:$0x76325410]  ;;  %v201_v11 = vcombine.high %v874_v4, %v875_v5  ;;  %v200_v13 = vcombine.low %v874_v4, %v875_v5 }
   0x5   :  { %v879_v14 = vld.sshfl [vmem:[%s1140_s0 + $0x38] sm:$0xff pattern:$0x76325410]  ;;  %v219_v17 = vcombine.high %v876_v7, %v877_v8  ;;  %v880_v18 = vld.sshfl [vmem:[%s1140_s0 + $0x40] sm:$0xff pattern:$0x76325410]  ;;  %v218_v22 = vcombine.low %v876_v7, %v877_v8 }
   0x6   :  { %v775_v15 = vpack.c.bf16 %v201_v11, %v183_v10  ;;  %v778_v16 = vpack.c.bf16 %v200_v13, %v182_v12  ;;  %v881_v19 = vld.sshfl [vmem:[%s1140_s0 + $0x48] sm:$0xff pattern:$0x76325410]  ;;  %v882_v20 = vld.sshfl [vmem:[%s1140_s0 + $0x50] sm:$0xff pattern:$0x76325410]  ;;  %v237_v21 = vcombine.high %v878_v9, %v879_v14  ;;  %v236_v23 = vcombine.low %v878_v9, %v879_v14 }
   0x7   :  { %v883_v24 = vld.sshfl [vmem:[%s1140_s0 + $0x58] sm:$0xff pattern:$0x76325410]  ;;  %v255_v26 = vcombine.high %v880_v18, %v881_v19  ;;  %v884_v27 = vld.sshfl [vmem:[%s1140_s0 + $0x60] sm:$0xff pattern:$0x76325410]  ;;  %v254_v38 = vcombine.low %v880_v18, %v881_v19 }
   0x8   :  { %777 = vmatprep.subr.msk.bf16.mxu0 %vm955_vm1, %v775_v15  ;;  %818 = vmatprep.subr.msk.bf16.mxu1 %vm955_vm1, %v775_v15  ;;  %v780_v25 = vpack.c.bf16 %v237_v21, %v219_v17  ;;  %v885_v28 = vld.sshfl [vmem:[%s1140_s0 + $0x68] sm:$0xff pattern:$0x76325410]  ;;  %v886_v29 = vld.sshfl [vmem:[%s1140_s0 + $0x70] sm:$0xff pattern:$0x76325410]  ;;  %v273_v30 = vcombine.high %v882_v20, %v883_v24  ;;  %v783_v32 = vpack.c.bf16 %v236_v23, %v218_v22 }
   0x9   :  { %779 = vmatpush1.bf16.xpose.msra.mxu0 %v778_v16  ;;  %826 = vmatpush1.bf16.xpose.msra.mxu1 %v778_v16  ;;  %v887_v31 = vld.sshfl [vmem:[%s1140_s0 + $0x78] sm:$0xff pattern:$0x76325410]  ;;  %v888_v34 = vld.sshfl [vmem:[%s1140_s0 + $0x80] sm:$0xff pattern:$0x76325410]  ;;  %v272_v39 = vcombine.low %v882_v20, %v883_v24  ;;  %v291_v40 = vcombine.high %v884_v27, %v885_v28  ;;  %v290_v48 = vcombine.low %v884_v27, %v885_v28 }
   0xa   :  { %782 = vmatprep.subr.msk.bf16.mxu0 %vm955_vm1, %v780_v25  ;;  %819 = vmatprep.subr.msk.bf16.mxu1 %vm955_vm1, %v780_v25  ;;  %v785_v33 = vpack.c.bf16 %v273_v30, %v255_v26  ;;  %v889_v35 = vld.sshfl [vmem:[%s1140_s0 + $0x88] sm:$0xff pattern:$0x76325410]  ;;  %v890_v36 = vld.sshfl [vmem:[%s1140_s0 + $0x90] sm:$0xff pattern:$0x76325410]  ;;  %v309_v41 = vcombine.high %v886_v29, %v887_v31  ;;  %v308_v49 = vcombine.low %v886_v29, %v887_v31 }
   0xb   :  { %v891_v37 = vld.sshfl [vmem:[%s1140_s0 + $0x98] sm:$0xff pattern:$0x76325410]  ;;  %v788_v42 = vpack.c.bf16 %v272_v39, %v254_v38  ;;  %v892_v44 = vld.sshfl [vmem:[%s1140_s0 + $0xa0] sm:$0xff pattern:$0x76325410]  ;;  %v327_v50 = vcombine.high %v888_v34, %v889_v35  ;;  %v326_v56 = vcombine.low %v888_v34, %v889_v35 }
   0xc   :  { %v790_v43 = vpack.c.bf16 %v309_v41, %v291_v40  ;;  %v893_v45 = vld.sshfl [vmem:[%s1140_s0 + $0xa8] sm:$0xff pattern:$0x76325410]  ;;  %v894_v46 = vld.sshfl [vmem:[%s1140_s0 + $0xb0] sm:$0xff pattern:$0x76325410]  ;;  %v345_v51 = vcombine.high %v890_v36, %v891_v37  ;;  %v793_v54 = vpack.c.bf16 %v308_v49, %v290_v48  ;;  %v344_v57 = vcombine.low %v890_v36, %v891_v37 }
   0xd   :  { %v895_v47 = vld.sshfl [vmem:[%s1140_s0 + $0xb8] sm:$0xff pattern:$0x76325410]  ;;  %v896_v58 = vld.sshfl [vmem:[%s1140_s0 + $0xc0] sm:$0xff pattern:$0x76325410]  ;;  %v363_v60 = vcombine.high %v892_v44, %v893_v45  ;;  %v362_v4 = vcombine.low %v892_v44, %v893_v45 }
   0xe   :  { %v33_v53 = vld [vmem:[%s1142_s1 + $0x58] sm:$0xff]  ;;  %v795_v55 = vpack.c.bf16 %v345_v51, %v327_v50  ;;  %v763_v59 = vld [vmem:[#allocation2] ss:$0 sm:$0xff]  ;;  %v381_v61 = vcombine.high %v894_v46, %v895_v47  ;;  %v897_v62 = vld.sshfl [vmem:[%s1140_s0 + $0xc8] sm:$0xff pattern:$0x76325410]  ;;  %v798_v2 = vpack.c.bf16 %v344_v57, %v326_v56  ;;  %v380_v5 = vcombine.low %v894_v46, %v895_v47 }
   0xf   :  { %760 = vmatprep.mubr.msk.f32.mxu1 %vm470_vm0, %v33_v53  ;;  %v898_v63 = vld.sshfl [vmem:[%s1140_s0 + $0xd0] sm:$0xff pattern:$0x76325410]  ;;  %v899_v0 = vld.sshfl [vmem:[%s1140_s0 + $0xd8] sm:$0xff pattern:$0x76325410]  ;;  %645 = vperm.xlu0 %839, %v763_v59   ;;  %v399_v8 = vcombine.high %v896_v58, %v897_v62  ;;  %v398_v15 = vcombine.low %v896_v58, %v897_v62 }
  0x10   :  { %v653_v1 = vld [vmem:[%s1143_s4] sm:$0x3]  ;;  %v800_v3 = vpack.c.bf16 %v381_v61, %v363_v60  ;;  %v417_v9 = vcombine.high %v898_v63, %v899_v0  ;;  %v901_v10 = vld.sshfl [vmem:[%s1140_s0 + $0xe8] sm:$0xff pattern:$0x76325410]  ;;  %v803_v13 = vpack.c.bf16 %v380_v5, %v362_v4  ;;  %v416_v16 = vcombine.low %v898_v63, %v899_v0  ;;  %v32_v25 = vld [vmem:[%s1142_s1 + $0x50] sm:$0xff] }
  0x11   :  { %784 = vmatpush1.bf16.xpose.msra.mxu0 %v783_v32  ;;  %827 = vmatpush1.bf16.xpose.msra.mxu1 %v783_v32  ;;  %v900_v7 = vld.sshfl [vmem:[%s1140_s0 + $0xe0] sm:$0xff pattern:$0x76325410]  ;;  %v902_v11 = vld.sshfl [vmem:[%s1140_s0 + $0xf0] sm:$0xff pattern:$0x76325410] }
  0x12   :  { %787 = vmatprep.subr.msk.bf16.mxu0 %vm955_vm1, %v785_v33  ;;  %820 = vmatprep.subr.msk.bf16.mxu1 %vm955_vm1, %v785_v33  ;;  %v903_v12 = vld.sshfl [vmem:[%s1140_s0 + $0xf8] sm:$0xff pattern:$0x76325410]  ;;  %v805_v14 = vpack.c.bf16 %v417_v9, %v399_v8  ;;  %v435_v17 = vcombine.high %v900_v7, %v901_v10  ;;  %v808_v19 = vpack.c.bf16 %v416_v16, %v398_v15  ;;  %v22_v24 = vld [vmem:[%s1142_s1] sm:$0xff]  ;;  %v35_v6 = vld [vmem:[%s1142_s1 + $0x68] sm:$0xff]  ;;  %v905_v37 = vmov 0.0|0.0  }
  0x13   :  { %656 = vperm.xlu0 %839, %v653_v1   ;;  %v453_v18 = vcombine.high %v902_v11, %v903_v12  ;;  %v434_v21 = vcombine.low %v900_v7, %v901_v10  ;;  %v452_v22 = vcombine.low %v902_v11, %v903_v12  ;;  %v25_v26 = vld [vmem:[%s1142_s1 + $0x18] sm:$0xff]  ;;  %v24_v27 = vld [vmem:[%s1142_s1 + $0x10] sm:$0xff]  ;;  %v34_v28 = vld [vmem:[%s1142_s1 + $0x60] sm:$0xff]  ;;  %v907_v38 = vmov 0.0  }
  0x14   :  { %v27_v29 = vld [vmem:[%s1142_s1 + $0x28] sm:$0xff]  ;;  %v37_v30 = vld [vmem:[%s1142_s1 + $0x78] sm:$0xff]  ;;  %v26_v31 = vld [vmem:[%s1142_s1 + $0x20] sm:$0xff] }
  0x15   :  { %v810_v20 = vpack.c.bf16 %v453_v18, %v435_v17  ;;  %v813_v23 = vpack.c.bf16 %v452_v22, %v434_v21  ;;  %v36_v32 = vld [vmem:[%s1142_s1 + $0x70] sm:$0xff]  ;;  %v29_v33 = vld [vmem:[%s1142_s1 + $0x38] sm:$0xff]  ;;  %v31_v35 = vld [vmem:[%s1142_s1 + $0x48] sm:$0xff] }
  0x16   :  { %v28_v34 = vld [vmem:[%s1142_s1 + $0x30] sm:$0xff]  ;;  %v30_v36 = vld [vmem:[%s1142_s1 + $0x40] sm:$0xff] }
  0x19   :  { %789 = vmatpush1.bf16.xpose.msra.mxu0 %v788_v42  ;;  %828 = vmatpush1.bf16.xpose.msra.mxu1 %v788_v42 }
  0x1a   :  { %792 = vmatprep.subr.msk.bf16.mxu0 %vm955_vm1, %v790_v43  ;;  %821 = vmatprep.subr.msk.bf16.mxu1 %vm955_vm1, %v790_v43 }
  0x21   :  { %794 = vmatpush1.bf16.xpose.msra.mxu0 %v793_v54  ;;  %829 = vmatpush1.bf16.xpose.msra.mxu1 %v793_v54 }
  0x22   :  { %797 = vmatprep.subr.msk.bf16.mxu0 %vm955_vm1, %v795_v55  ;;  %822 = vmatprep.subr.msk.bf16.mxu1 %vm955_vm1, %v795_v55 }
  0x29   :  { %799 = vmatpush1.bf16.xpose.msra.mxu0 %v798_v2  ;;  %830 = vmatpush1.bf16.xpose.msra.mxu1 %v798_v2 }
  0x2a   :  { %802 = vmatprep.subr.msk.bf16.mxu0 %vm955_vm1, %v800_v3  ;;  %823 = vmatprep.subr.msk.bf16.mxu1 %vm955_vm1, %v800_v3  ;;  %v652_v3 = vld [vmem:[%s1144_s3] sm:$0x3] }
  0x31   :  { %804 = vmatpush1.bf16.xpose.msra.mxu0 %v803_v13  ;;  %831 = vmatpush1.bf16.xpose.msra.mxu1 %v803_v13 }
  0x32   :  { %807 = vmatprep.subr.msk.bf16.mxu0 %vm955_vm1, %v805_v14  ;;  %824 = vmatprep.subr.msk.bf16.mxu1 %vm955_vm1, %v805_v14 }
  0x39   :  { %809 = vmatpush1.bf16.xpose.msra.mxu0 %v808_v19  ;;  %832 = vmatpush1.bf16.xpose.msra.mxu1 %v808_v19 }
  0x3a   :  { %812 = vmatprep.subr.msk.bf16.mxu0 %vm955_vm1, %v810_v20  ;;  %825 = vmatprep.subr.msk.bf16.mxu1 %vm955_vm1, %v810_v20 }
  0x41   :  { %814 = vmatpush1.bf16.xpose.msra.mxu0 %v813_v23  ;;  %833 = vmatpush1.bf16.xpose.msra.mxu1 %v813_v23 }
  0x42   :  { %815 = vmatprep.subr.bf16.mxu1 %v905_v37 }
  0x48   :  { %592 = vmatmul.mubr.f32.vlgmr.msra.gmra.mrb[0].mxu0 %v22_v24  ;;  %617 = vmatmul.mubr.f32.vlgmr.msra.gmra.mrb[0].mxu1 %v32_v25 }
  0x49   :  { %756 = vmatprep.mubr.msk.f32.mxu0 %vm470_vm0, %v25_v26  ;;  %761 = vmatprep.mubr.msk.f32.mxu1 %vm470_vm0, %v35_v6 }
  0x4c   :  { %597 = vmatmul.mubr.f32.gmra.mrb[2].mxu0 %v24_v27  ;;  %622 = vmatmul.mubr.f32.gmra.mrb[2].mxu1 %v34_v28 }
  0x4d   :  { %757 = vmatprep.mubr.msk.f32.mxu0 %vm470_vm0, %v27_v29  ;;  %762 = vmatprep.mubr.msk.f32.mxu1 %vm470_vm0, %v37_v30 }
  0x50   :  { %602 = vmatmul.mubr.f32.gmra.mrb[4].mxu0 %v26_v31  ;;  %627 = vmatmul.mubr.f32.gmra.mrb[4].mxu1 %v36_v32 }
  0x51   :  { %758 = vmatprep.mubr.msk.f32.mxu0 %vm470_vm0, %v29_v33  ;;  %772 = vmatprep.mubr.msk.f32.mxu1 %vm906_vm2, %v907_v38 }
  0x54   :  { %607 = vmatmul.mubr.f32.gmra.mrb[6].mxu0 %v28_v34 }
  0x55   :  { %759 = vmatprep.mubr.msk.f32.mxu0 %vm470_vm0, %v31_v35 }
  0x58   :  { %612 = vmatmul.mubr.f32.gmra.mrb[8].mxu0 %v30_v36 }
  0x8e   :  { %v646_v57 = vpop.permute.xlu0 %645 }
  0x92   :  { %v657_v4 = vpop.permute.xlu0 %656 }
 0x11b   :  { %v593_v39 = vpop.f32.mrb[0].mxu0  ;;  %v618_v40 = vpop.f32.mrb[0].mxu1 }
 0x11c   :  { %v595_v41 = vpop.f32.mrb[1].mxu0  ;;  %v620_v42 = vpop.f32.mrb[1].mxu1 }
 0x11f   :  { %v598_v43 = vpop.f32.mrb[2].mxu0  ;;  %v623_v44 = vpop.f32.mrb[2].mxu1 }
 0x120   :  { %v600_v45 = vpop.f32.mrb[3].mxu0  ;;  %v625_v46 = vpop.f32.mrb[3].mxu1 }
 0x123   :  { %v603_v47 = vpop.f32.mrb[4].mxu0  ;;  %v628_v48 = vpop.f32.mrb[4].mxu1 }
 0x124   :  { %v632_v49 = vmax.f32 %v593_v39, %v603_v47  ;;  %v635_v50 = vmax.f32 %v618_v40, %v628_v48  ;;  %v605_v51 = vpop.f32.mrb[5].mxu0  ;;  %v630_v52 = vpop.f32.mrb[5].mxu1 }
 0x127   :  { %v608_v53 = vpop.f32.mrb[6].mxu0 }
 0x128   :  { %v633_v54 = vmax.f32 %v598_v43, %v608_v53  ;;  %v610_v55 = vpop.f32.mrb[7].mxu0 }
 0x12a   :  { %v637_v56 = vmax.f32 %v633_v54, %v635_v50 }
 0x12b   :  { %v613_v58 = vpop.f32.mrb[8].mxu0 }
 0x12c   :  { %v634_v59 = vmax.f32 %v613_v58, %v623_v44  ;;  %v615_v60 = vpop.f32.mrb[9].mxu0  ;;  %v649_v61 = vadd.f32 %v646_v57, %v637_v56 }
 0x12e   :  { %v636_v62 = vmax.f32 %v632_v49, %v634_v59  ;;  %v651_v0 = vmax.f32 %v649_v61, 0.0 }
 0x130   :  { %v648_v63 = vadd.f32 %v646_v57, %v636_v62 }
 0x132   :  { %v650_v1 = vmax.f32 %v648_v63, 0.0 }
 0x134   :  { %v816_v2 = vpack.c.bf16 %v651_v0, %v650_v1 }
 0x136   :  { %817 = vmatpush3.bf16.msra.mxu1 %v816_v2 }
 0x139   :  { %773 = vmatmul.mubr.msk.f32.vlgmr.msra.gmra.mrb[6].mxu1 %vm659_vm3, %v652_v3 }
 0x20c   :  { %v729_v5 = vpop.f32.mrb[6].mxu1 }
 0x20d   :  { %v730_v7 = vadd.f32 %v729_v5, %v657_v4  ;;  %v774_v8 = vpop.f32.mrb[7].mxu1 }
 0x20f   :  { %v733_v9 = vmax.f32 %v730_v7, 0.0 }
 0x211   :  { %734 = vst [vmem:[%s1145_s5] sm:$0x3] %v733_v9 }

</bundles_post_ra>
